<compile_context>
chip_gen: v7x
topology: tpu7x:2x2x1
jax: 0.10.0
libtpu: 0.0.40
codegen_flags: <defaults>
</compile_context>

<pallas_src>
import functools

import jax
import jax.numpy as jnp
from jax.experimental import pallas as pl
from jax.experimental.pallas import tpu as pltpu


def _pick_tile(n, max_tile):
    """Second-minor tile size: multiple of 8 (or the full extent when tiny),
    capped at max_tile, and aiming for >= 2 grid steps so both v7x TensorCores
    get work (single-TC v5e/v6e are unaffected)."""
    if n <= 8:
        return n
    half = (n + 1) // 2
    half = ((half + 7) // 8) * 8
    t = min(max_tile, half)
    return max(8, (t // 8) * 8)


# ----------------------------------------------------------------------------
# Kernel 1: LayerNorm(D, eps=1e-6)   (== self.norm in MMOD.forward)
# ----------------------------------------------------------------------------
def layernorm_kernel(x_ref, g_ref, b_ref, o_ref, *, eps):
    x = x_ref[...].astype(jnp.float32)                        # (TR, D)
    d = x.shape[-1]
    # centered two-pass variance: extra VPU pass is free on a mem-bound kernel
    # and avoids the E[x^2]-mean^2 cancellation.
    mean = jnp.sum(x, axis=-1, keepdims=True) * (1.0 / d)
    xc = x - mean
    var = jnp.sum(xc * xc, axis=-1, keepdims=True) * (1.0 / d)
    rstd = jax.lax.rsqrt(var + eps)                           # EUP slot
    o_ref[...] = (xc * rstd * g_ref[...] + b_ref[...]).astype(o_ref.dtype)


def layernorm(x, gamma, beta, eps=1e-6, tile_rows=1024):
    """x: (B, L, D) -> (B, L, D); exact nn.LayerNorm(D, eps) semantics.
    Works for f32 or bf16 x (stats always in f32)."""
    B, L, D = x.shape
    N = B * L
    x2 = x.reshape(N, D)
    tr = _pick_tile(N, tile_rows)
    grid = (pl.cdiv(N, tr),)

    itemsize = x.dtype.itemsize
    cost = pl.CostEstimate(
        flops=int(10 * N * D),
        transcendentals=int(N),
        bytes_accessed=int(2 * N * D * itemsize + 2 * D * 4),
    )
    const = dict(pipeline_mode=pl.Buffered(1))  # constant block index -> 1 buffer

    out = pl.pallas_call(
        functools.partial(layernorm_kernel, eps=eps),
        out_shape=jax.ShapeDtypeStruct((N, D), x.dtype),
        grid=grid,
        in_specs=[
            pl.BlockSpec((tr, D), lambda i: (i, 0)),                  # x tile
            pl.BlockSpec((1, D), lambda i: (0, 0), **const),          # gamma
            pl.BlockSpec((1, D), lambda i: (0, 0), **const),          # beta
        ],
        out_specs=pl.BlockSpec((tr, D), lambda i: (i, 0)),
        compiler_params=pltpu.CompilerParams(
            dimension_semantics=("parallel",),
            vmem_limit_bytes=32 * 1024 * 1024),
        cost_estimate=cost,
    )(x2,
      gamma.reshape(1, D).astype(jnp.float32),
      beta.reshape(1, D).astype(jnp.float32))
    return out.reshape(B, L, D)


# ----------------------------------------------------------------------------
# Kernel 2: fused head
#   (no concat) -> img@W1a + txt@W1b + b1 -> ReLU -> Linear(D,1) -> logits
#   plus F.normalize(img, dim=1), F.normalize(txt, dim=1)
# ----------------------------------------------------------------------------
def head_kernel(img_ref, txt_ref, w1i_ref, w1t_ref, b1_ref, w2_ref, b2_ref,
                img_n_ref, txt_n_ref, logit_ref, *, mm_dtype):
    # read each embedding ref exactly once
    img = img_ref[...]                                        # (TB, D)
    txt = txt_ref[...]                                        # (TB, D)
    img_f32 = img.astype(jnp.float32)
    txt_f32 = txt.astype(jnp.float32)

    # classifier hidden: two accumulated matmuls replace concat + one matmul.
    # mm_dtype=bf16 feeds the MXU at full rate (native bf16 MXU on v5e/v6e/v7x
    # alike) and halves the weight DMA; accumulation stays f32.
    h = (jnp.dot(img.astype(mm_dtype), w1i_ref[...],
                 preferred_element_type=jnp.float32)
         + jnp.dot(txt.astype(mm_dtype), w1t_ref[...],
                   preferred_element_type=jnp.float32)
         + b1_ref[...])
    h = jnp.maximum(h, 0.0)                                   # (TB, D) f32

    # Linear(D, 1): w2(1,D) contracted against h(TB,D) on its last dim (A@B^T
    # pattern) -> (1, TB): result is already lane-dense, so the logits store is
    # an unmasked full-row vst instead of a masked (TB,1) partial store.
    logits_row = jax.lax.dot_general(
        w2_ref[...], h, (((1,), (1,)), ((), ())),
        preferred_element_type=jnp.float32) + b2_ref[...]
    logit_ref[...] = logits_row.astype(logit_ref.dtype)       # (1, TB)

    # F.normalize(x, p=2, dim=1, eps=1e-12) == x * rsqrt(max(sum(x^2), eps^2))
    def l2norm(x):
        ss = jnp.sum(x * x, axis=-1, keepdims=True)
        inv = jax.lax.rsqrt(jnp.maximum(ss, 1e-24))           # EUP rsqrt + vmul
        return x * inv

    txt_n_ref[...] = l2norm(txt_f32).astype(txt_n_ref.dtype)
    img_n_ref[...] = l2norm(img_f32).astype(img_n_ref.dtype)


def mmod_head(image_embeddings, text_embeddings, w1, b1, w2, b2,
              *, mm_dtype=jnp.bfloat16, tile_b=512):
    """image/text embeddings: (B, D) f32 or bf16. Returns (txt_n, img_n, logits)
    in the input dtype (stats / accumulation in f32)."""
    B, D = image_embeddings.shape
    dt = image_embeddings.dtype

    # split W1 (2D, D) -> the two matmul operands (pre-cast to the MXU dtype so
    # the weight DMA footprint is halved when mm_dtype=bf16).
    w1_img = w1[:D].astype(mm_dtype)
    w1_txt = w1[D:].astype(mm_dtype)
    b1_2d = b1.reshape(1, D).astype(jnp.float32)
    w2_row = w2.reshape(1, D).astype(jnp.float32)             # (D,1) -> (1,D)
    b2_2d = b2.reshape(1, 1).astype(jnp.float32)

    tb = _pick_tile(B, tile_b)
    nt = pl.cdiv(B, tb)
    grid = (nt,)

    itemsize = dt.itemsize
    w_itemsize = jnp.dtype(mm_dtype).itemsize
    cost = pl.CostEstimate(
        flops=int(4 * B * D * D + 6 * B * D),
        transcendentals=int(2 * B),
        bytes_accessed=int(4 * B * D * itemsize            # img/txt in + out
                           + 2 * D * D * w_itemsize        # W1 halves
                           + (3 * D + 1) * 4               # b1, w2, b2
                           + nt * tb * itemsize),          # logits
    )
    const = dict(pipeline_mode=pl.Buffered(1))  # constant block index -> 1 buffer

    img_n, txt_n, logits2d = pl.pallas_call(
        functools.partial(head_kernel, mm_dtype=mm_dtype),
        out_shape=(
            jax.ShapeDtypeStruct((B, D), dt),    # normalized image embeddings
            jax.ShapeDtypeStruct((B, D), dt),    # normalized text embeddings
            jax.ShapeDtypeStruct((nt, tb), dt),  # lane-dense logits rows
        ),
        grid=grid,
        in_specs=[
            pl.BlockSpec((tb, D), lambda i: (i, 0)),                  # img tile
            pl.BlockSpec((tb, D), lambda i: (i, 0)),                  # txt tile
            pl.BlockSpec((D, D), lambda i: (0, 0), **const),          # W1[:D]
            pl.BlockSpec((D, D), lambda i: (0, 0), **const),          # W1[D:]
            pl.BlockSpec((1, D), lambda i: (0, 0), **const),          # b1
            pl.BlockSpec((1, D), lambda i: (0, 0), **const),          # w2 row
            pl.BlockSpec((1, 1), lambda i: (0, 0), **const),          # b2
        ],
        out_specs=(
            pl.BlockSpec((tb, D), lambda i: (i, 0)),
            pl.BlockSpec((tb, D), lambda i: (i, 0)),
            pl.BlockSpec((1, tb), lambda i: (i, 0)),                  # lane-dense
        ),
        compiler_params=pltpu.CompilerParams(
            dimension_semantics=("parallel",),
            vmem_limit_bytes=32 * 1024 * 1024),
        cost_estimate=cost,
    )(image_embeddings, text_embeddings, w1_img, w1_txt, b1_2d, w2_row, b2_2d)

    logits = logits2d.reshape(-1)[:B]   # drop the last tile's padded rows
    return txt_n, img_n, logits


# ----------------------------------------------------------------------------
# MMOD forward (post-encoder portion)
# ----------------------------------------------------------------------------
def mmod_forward(queries_features, image_embeddings, text_embeddings, params,
                 *, mm_dtype=jnp.bfloat16):
    # queries_features = self.norm(queries_features)
    qf_normed = layernorm(queries_features, params["ln_gamma"], params["ln_beta"])
    # TODO(synk): self.pipeline (CrossModalFusionModule) and the ViT/RoBERTa/
    # Img_3d_Fusion encoders are undefined external modules; image/text
    # embeddings are taken as inputs.  qf_normed is returned so the LN kernel
    # is not dead-code-eliminated.
    txt_n, img_n, logits = mmod_head(
        image_embeddings, text_embeddings,
        params["w1"], params["b1"], params["w2"], params["b2"],
        mm_dtype=mm_dtype)
    return txt_n, img_n, logits, qf_normed


def init_params(key, d_model):
    ks = jax.random.split(key, 4)
    lim1 = 1.0 / jnp.sqrt(2.0 * d_model)
    lim2 = 1.0 / jnp.sqrt(1.0 * d_model)
    return {
        "ln_gamma": jnp.ones((d_model,), jnp.float32),
        "ln_beta": jnp.zeros((d_model,), jnp.float32),
        # stored as (in, out) so the head computes x @ W + b
        "w1": jax.random.uniform(ks[0], (2 * d_model, d_model), jnp.float32, -lim1, lim1),
        "b1": jax.random.uniform(ks[1], (d_model,), jnp.float32, -lim1, lim1),
        "w2": jax.random.uniform(ks[2], (d_model, 1), jnp.float32, -lim2, lim2),
        "b2": jax.random.uniform(ks[3], (1,), jnp.float32, -lim2, lim2),
    }


if __name__ == "__main__":
    B, L, D = 2, 8, 256   # small stand-ins for batch / seq / d_model(=768)
    key = jax.random.PRNGKey(0)
    k_q, k_i, k_t, k_p = jax.random.split(key, 4)

    queries_features = jax.random.normal(k_q, (B, L, D), jnp.float32)
    image_embeddings = jax.random.normal(k_i, (B, D), jnp.float32)
    text_embeddings = jax.random.normal(k_t, (B, D), jnp.float32)
    params = init_params(k_p, D)

    # pure-JAX reference (torch semantics)
    def ref_forward(qf, img, txt, p):
        mean = jnp.mean(qf, axis=-1, keepdims=True)
        var = jnp.mean((qf - mean) ** 2, axis=-1, keepdims=True)
        qf_n = (qf - mean) / jnp.sqrt(var + 1e-6) * p["ln_gamma"] + p["ln_beta"]
        cat = jnp.concatenate([img, txt], axis=1)
        h = jnp.maximum(cat @ p["w1"] + p["b1"], 0.0)
        lg = (h @ p["w2"] + p["b2"])[:, 0]
        n = lambda x: x / jnp.maximum(
            jnp.sqrt(jnp.sum(x * x, axis=1, keepdims=True)), 1e-12)
        return n(txt), n(img), lg, qf_n

    r_txt, r_img, r_lg, r_qf = ref_forward(
        queries_features, image_embeddings, text_embeddings, params)

    # --- f32 activation / f32-weight path (reference-faithful) ---
    txt_n, img_n, logits, qf_normed = mmod_forward(
        queries_features, image_embeddings, text_embeddings, params,
        mm_dtype=jnp.float32)
    jax.block_until_ready((txt_n, img_n, logits, qf_normed))

    assert txt_n.shape == (B, D) and img_n.shape == (B, D)
    assert logits.shape == (B,) and qf_normed.shape == (B, L, D)
    assert jnp.allclose(txt_n, r_txt, atol=1e-5)
    assert jnp.allclose(img_n, r_img, atol=1e-5)
    assert jnp.allclose(logits, r_lg, atol=2e-3)     # MXU f32-pass tolerance
    assert jnp.allclose(qf_normed, r_qf, atol=2e-5)

    # --- bf16 activation + bf16 MXU-weight path (HBM-bandwidth optimization) ---
    txt_b, img_b, logits_b, qf_b = mmod_forward(
        queries_features.astype(jnp.bfloat16),
        image_embeddings.astype(jnp.bfloat16),
        text_embeddings.astype(jnp.bfloat16),
        params, mm_dtype=jnp.bfloat16)
    jax.block_until_ready((txt_b, img_b, logits_b, qf_b))

    assert jnp.allclose(txt_b.astype(jnp.float32), r_txt, atol=2e-2)
    assert jnp.allclose(img_b.astype(jnp.float32), r_img, atol=2e-2)
    assert jnp.allclose(logits_b.astype(jnp.float32), r_lg, atol=3e-1)

    print("KERNEL_OK")
</pallas_src>

<mosaic_0001>
module attributes {stable_mosaic.version = 11 : i64} {
  func.func @layernorm_kernel(%arg0: i32, %arg1: memref<8x256xf32, #tpu.memory_space<vmem>>, %arg2: memref<1x256xf32, #tpu.memory_space<vmem>>, %arg3: memref<1x256xf32, #tpu.memory_space<vmem>>, %arg4: memref<8x256xf32, #tpu.memory_space<vmem>>) attributes {dimension_semantics = [#tpu.dimension_semantics<parallel>], iteration_bounds = array<i64: 2>, scalar_prefetch = 0 : i64, scratch_operands = 0 : i64, tpu.core_type = #tpu.core_type<tc>, window_params = [{transform_indices = @transform_0, window_bounds = array<i64: 8, 256>}, {pipeline_mode = #tpu.pipeline_mode<synchronous>, transform_indices = @transform_1, window_bounds = array<i64: 1, 256>}, {pipeline_mode = #tpu.pipeline_mode<synchronous>, transform_indices = @transform_2, window_bounds = array<i64: 1, 256>}, {transform_indices = @transform_3, window_bounds = array<i64: 8, 256>}]} {
    %c0 = arith.constant 0 : index
    %c0_0 = arith.constant 0 : index
    %0 = vector.load %arg1[%c0, %c0_0] : memref<8x256xf32, #tpu.memory_space<vmem>>, vector<8x256xf32>
    %cst = arith.constant dense<0.000000e+00> : vector<8xf32>
    %1 = vector.multi_reduction <add>, %0, %cst [1] : vector<8x256xf32> to vector<8xf32>
    %2 = vector.shape_cast %1 : vector<8xf32> to vector<8x1xf32>
    %cst_1 = arith.constant 3.906250e-03 : f32
    %3 = vector.broadcast %cst_1 : f32 to vector<8x1xf32>
    %4 = arith.mulf %2, %3 : vector<8x1xf32>
    %5 = vector.broadcast %4 : vector<8x1xf32> to vector<8x256xf32>
    %6 = arith.subf %0, %5 : vector<8x256xf32>
    %7 = arith.mulf %6, %6 : vector<8x256xf32>
    %cst_2 = arith.constant dense<0.000000e+00> : vector<8xf32>
    %8 = vector.multi_reduction <add>, %7, %cst_2 [1] : vector<8x256xf32> to vector<8xf32>
    %9 = vector.shape_cast %8 : vector<8xf32> to vector<8x1xf32>
    %cst_3 = arith.constant 3.906250e-03 : f32
    %10 = vector.broadcast %cst_3 : f32 to vector<8x1xf32>
    %11 = arith.mulf %9, %10 : vector<8x1xf32>
    %cst_4 = arith.constant 9.99999997E-7 : f32
    %12 = vector.broadcast %cst_4 : f32 to vector<8x1xf32>
    %13 = arith.addf %11, %12 : vector<8x1xf32>
    %14 = math.rsqrt %13 : vector<8x1xf32>
    %15 = vector.broadcast %14 : vector<8x1xf32> to vector<8x256xf32>
    %16 = arith.mulf %6, %15 : vector<8x256xf32>
    %c0_5 = arith.constant 0 : index
    %c0_6 = arith.constant 0 : index
    %17 = vector.load %arg2[%c0_5, %c0_6] : memref<1x256xf32, #tpu.memory_space<vmem>>, vector<1x256xf32>
    %18 = vector.broadcast %17 : vector<1x256xf32> to vector<8x256xf32>
    %19 = arith.mulf %16, %18 : vector<8x256xf32>
    %c0_7 = arith.constant 0 : index
    %c0_8 = arith.constant 0 : index
    %20 = vector.load %arg3[%c0_7, %c0_8] : memref<1x256xf32, #tpu.memory_space<vmem>>, vector<1x256xf32>
    %21 = vector.broadcast %20 : vector<1x256xf32> to vector<8x256xf32>
    %22 = arith.addf %19, %21 : vector<8x256xf32>
    %c0_9 = arith.constant 0 : index
    %c0_10 = arith.constant 0 : index
    %23 = vector.load %arg4[%c0_9, %c0_10] : memref<8x256xf32, #tpu.memory_space<vmem>>, vector<8x256xf32>
    tpu.vector_store %arg4[%c0_9, %c0_10], %22 {strides = array<i32>} : memref<8x256xf32, #tpu.memory_space<vmem>>, vector<8x256xf32>,
    return
  }
  func.func @transform_0(%arg0: i32) -> (i32, i32) {
    %c0_i32 = arith.constant 0 : i32
    %c0_i32_0 = arith.constant 0 : i32
    return %arg0, %c0_i32 : i32, i32
  }
  func.func @transform_1(%arg0: i32) -> (i32, i32) {
    %c0_i32 = arith.constant 0 : i32
    %c0_i32_0 = arith.constant 0 : i32
    %c0_i32_1 = arith.constant 0 : i32
    return %c0_i32, %c0_i32_0 : i32, i32
  }
  func.func @transform_2(%arg0: i32) -> (i32, i32) {
    %c0_i32 = arith.constant 0 : i32
    %c0_i32_0 = arith.constant 0 : i32
    %c0_i32_1 = arith.constant 0 : i32
    return %c0_i32, %c0_i32_0 : i32, i32
  }
  func.func @transform_3(%arg0: i32) -> (i32, i32) {
    %c0_i32 = arith.constant 0 : i32
    %c0_i32_0 = arith.constant 0 : i32
    return %arg0, %c0_i32 : i32, i32
  }
}

</mosaic_0001>

<bundles_post_ra>
// kernel: tpu_custom_call.1
= control target key start
LH: loop header
LB: loop body
LE: loop exit
PB: predicated region body
PF: predicated region fallthrough
CT: control target
= control target key end

     0   :  { %8 = vsyncpa [#allocation3], 0  ;;  %s675_s0 = inlined_call_operand.hbm [shape: f32[16,256], index: 0, kind: input, shape index: {}]   ;;  %s676_s1 = inlined_call_operand.vmem [shape: f32[1,256], index: 1, kind: input, shape index: {}]   ;;  %s677_s2 = inlined_call_operand.vmem [shape: f32[1,256], index: 2, kind: input, shape index: {}]   ;;  %s678_s3 = inlined_call_operand.hbm [shape: f32[16,256], index: 3, kind: output, shape index: {}]  }
   0x1   :  { %10 = vsyncpa [#allocation3 + $0x1], 0 }
   0x2   :  { %11 = vsyncpa [#allocation4], 0 }
   0x3   :  { %13 = vsyncpa [#allocation4 + $0x1], 0  ;;  %s504_s12 = smov 0   ;;  %s506_s13 = smov 0  }
   0x4   :  { %s508_s14 = smov 0   ;;  %s510_s15 = smov 0  }
   0x5 LB: > { %s525_s16 = sadd.s32 4294967295, %s480_s15   ;;  %s320_s17 = sadd.s32 4294967294, %s480_s15   ;;  %s480_s15 = sphi %s510_s15, %s693_s15   ;;  %s476_s14 = sphi %s508_s14, %s692_s14   ;;  %s472_s13 = sphi %s506_s13, %s691_s13   ;;  %s468_s12 = sphi %s504_s12, %s690_s12  }
   0x6   : > { %s529_s18 = sadd.s32 1, %s480_s15   ;;  %s26_s19 = sadd.s32 1, %s476_s14 }
   0x7   : > { %s23_s20 = ssub.s32 %s480_s15, %s529_s18  ;;  %p33_p0 = scmp.ne.s32.totalorder %s476_s14, %s472_s13 }
   0x8   : > { %p24_p1 = scmp.eq.s32.totalorder %s23_s20, 0  ;;  %p34_p2 = scmp.eq.s32.totalorder %s480_s15, 0 }
   0x9   : > { %p39_p3 = scmp.ne.s32.totalorder %s472_s13, %s468_s12  ;;  %p40_p4 = scmp.eq.s32.totalorder %s525_s16, 0 }
   0xa   : > { %s541_s21 = scalar_select %p24_p1, %s476_s14, %s26_s19  }
   0xb   : > { %p543_p5 = por %p34_p2, %p33_p0  ;;  %p547_p6 = por %p40_p4, %p39_p3 }
   0xc   : > { %p105_p7 = scmp.eq.s32.totalorder %s525_s16, 1  ;;  %p111_p8 = scmp.eq.s32.totalorder %s320_s17, 1 }
   0xd   : > { %p348_p10 = scmp.lt.s32.totalorder %s480_s15, 2  ;;  %s137_s26 = sand.u32 1, %s476_s14  }
   0xe   : > { %p554_p11 = por %p105_p7, %p33_p0  ;;  %p558_p12 = por %p111_p8, %p39_p3 }
   0xf   : > { %s334_s27 = sshll.u32 %s480_s15, 8  ;;  %s323_s28 = sshll.u32 %s137_s26, 4 }
  0x10   : > { %s682_s24 = scalar_select %p554_p11, 1, 0 }
  0x11   : > { %s683_s25 = scalar_select %p558_p12, 1, 0 }
  0x12   : > { %s567_s4 = scalar_lea.hbm %s675_s0, %s334_s27  ;;  %s141_s5 = scalar_lea.vmem [#allocation2], %s323_s28 }
  0x13   : > { %s149_s6 = sshll.u32 %s141_s5, 4  ;;  %p571_p13 = pnand %p348_p10, %p543_p5  ;;  %s575_s6 = int_to_ptr.vmem [resolvable:$true] %s149_s6 }
  0x14   : > { %s138_s8 = scalar_lea.sflag [#allocation3], %s137_s26  ;;  %s384_s9 = scalar_lea.hbm %s567_s4, 256 }
  0x15   : > { %p385_p2 = scmp.ne.s32.totalorder %s567_s4, %s384_s9  ;;  %p386_p3 = pneg %p571_p13 }
  0x16   : > { %s389_s17 = scalar_lea.hbm %s675_s0, 512  ;;  %p390_p5 = scmp.lt.u32.totalorder %s567_s4, %s675_s0 }
  0x17   : > { %p387_p4 = pnand %p386_p3, %p385_p2  ;;  %p391_p8 = scmp.lt.u32.totalorder %s389_s17, %s384_s9 }
  0x18   : > { %p393_p9 = scmp.lt.u32.totalorder %s384_s9, %s567_s4 }
  0x19   : > { %p388_p7 = pneg %p387_p4  ;;  %p392_p10 = por %p391_p8, %p390_p5 }
  0x1b   : > { %p394_p0 = por %p393_p9, %p392_p10 }
  0x1d   : > { %p395_p1 = pnand %p394_p0, %p388_p7 }
  0x1f   : > { %398 = shalt.err (!%p395_p1)
}
  0x20   : > { %s399_s22 = scalar_lea.vmem %s575_s6, 256  ;;  %s482_s26 = smov [#allocation2]  }
  0x21   : > { %p400_p2 = scmp.ne.s32.totalorder %s575_s6, %s399_s22  ;;  %s404_s27 = sshll.u32 %s482_s26, 4  ;;  %s405_s27 = int_to_ptr.vmem [resolvable:$false] %s404_s27 }
  0x22   : > { %s406_s28 = scalar_lea.vmem %s405_s27, 512  ;;  %p407_p11 = scmp.lt.s32.totalorder %s575_s6, %s405_s27 }
  0x23   : > { %p402_p4 = pnand %p400_p2, %p386_p3  ;;  %p408_p5 = scmp.lt.s32.totalorder %s406_s28, %s399_s22 }
  0x25   : > { %p403_p12 = pneg %p402_p4  ;;  %p409_p8 = por %p408_p5, %p407_p11 }
  0x27   : > { %p410_p9 = pnand %p409_p8, %p403_p12 }
  0x29   : > { %413 = shalt.err (!%p410_p9)
}
  0x2a   : > { %343 = dma.hbm_to_vmem [thread:$0]  (!%p571_p13), %s567_s4, 256, %s575_s6, %s138_s8  }
  0x2b   : > { %p685_p0 = scmp.lt.s32.totalorder %s480_s15, 3  ;;  %p686_p1 = scmp.ge.s32.totalorder %s480_s15, 1 }
  0x2d   : > { %p155_p3 = pnand %p686_p1, %p685_p0 }
  0x2e   : > { %s609_s29 = sand.u32 (!%p155_p3), 1, %s472_s13  }
  0x2f   : > { %158 = sbr.rel (%p155_p3) target bundleno = 385 (0x181), region = 32  ;;  %s327_s30 = sshll.u32 (!%p155_p3), %s609_s29, 4 }
  0x30   : > { %s161_s5 = scalar_lea.sflag (!%p155_p3), [#allocation3], %s609_s29  ;;  %s164_s7 = scalar_lea.vmem (!%p155_p3), [#allocation2], %s327_s30 }
  0x36   : > { %459 = dma.done.wait (%p547_p6), %s161_s5, 256  }
  0x37   : > { %461 = vsyncadd (%p547_p6), %s161_s5, 4294967040  ;;  %v187_v0 = vld [vmem:[%s164_s7] sm:$0xff]  ;;  %v188_v1 = vld [vmem:[%s164_s7 + $0x8] sm:$0xff]  ;;  %v207_v12 = vlaneseq  ;;  %s335_s9 = sshll.u32 %s525_s16, 8  ;;  %s186_s10 = scalar_lea.vmem [#allocation5], %s327_s30 }
  0x38   : > { %v189_v2 = vadd.f32 %v188_v1, %v187_v0  ;;  %v205_v17 = vld [vmem:[%s676_s1] sm:$0x3]  ;;  %s250_s11 = sshll.u32 %s186_s10, 4  ;;  %s631_s20 = scalar_lea.hbm %s678_s3, %s335_s9  ;;  %s633_s11 = int_to_ptr.vmem [resolvable:$true] %s250_s11 }
  0x39   : > { %v208_v14 = vshrl.u32 %v207_v12, 7  ;;  %v219_v18 = vld [vmem:[%s677_s2] sm:$0x3]  ;;  %s236_s16 = scalar_lea.sflag [#allocation4], %s609_s29  ;;  %s414_s22 = scalar_lea.vmem %s633_s11, 256 }
  0x3a   : > { %190 = vadd.xlane.f32.xlu0 %v189_v2  ;;  %p415_p6 = scmp.ne.s32.totalorder %s633_s11, %s414_s22  ;;  %p687_p11 = scmp.ne.s32.totalorder %s682_s24, 0 }
  0x3b   : > { %v209_v15 = vsub.s32 0, %v208_v14  ;;  %v213_v16 = vsub.s32 1, %v208_v14  ;;  %s483_s26 = smov [#allocation5]  }
  0x3c   : > { %p416_p12 = pnand %p415_p6, %p687_p11  ;;  %s418_s27 = sshll.u32 %s483_s26, 4  ;;  %s419_s27 = int_to_ptr.vmem [resolvable:$false] %s418_s27 }
  0x3d   : > { %v210_v19 = vrot.slane %v205_v17, %v209_v15  ;;  %v214_v20 = vrot.slane %v205_v17, %v213_v16  ;;  %v224_v24 = vrot.slane %v219_v18, %v209_v15  ;;  %v228_v25 = vrot.slane %v219_v18, %v213_v16  ;;  %s420_s28 = scalar_lea.vmem %s419_s27, 512  ;;  %p421_p7 = scmp.lt.s32.totalorder %s633_s11, %s419_s27 }
  0x3e   : > { %p417_p13 = pneg %p416_p12  ;;  %p422_p10 = scmp.lt.s32.totalorder %s420_s28, %s414_s22 }
  0x40   : > { %p423_p2 = por %p422_p10, %p421_p7 }
  0x42   : > { %p424_p4 = pnand %p423_p2, %p417_p13 }
  0xc7   : > { %v191_v3 = vpop.xlane.xlu0 %190 }
  0xc8   : > { %v192_v4 = vmul.f32 0.00390625, %v191_v3 }
  0xca   : > { %v193_v5 = vsub.f32 %v187_v0, %v192_v4  ;;  %v194_v6 = vsub.f32 %v188_v1, %v192_v4 }
  0xcc   : > { %v195_v7 = vmul.f32 %v193_v5, %v193_v5  ;;  %v196_v8 = vmul.f32 %v194_v6, %v194_v6 }
  0xce   : > { %v197_v9 = vadd.f32 %v196_v8, %v195_v7 }
  0xd0   : > { %198 = vadd.xlane.f32.xlu0 %v197_v9 }
 0x15d   : > { %v199_v10 = vpop.xlane.xlu0 %198 }
 0x15e   : > { %v200_v11 = vmul.f32 0.00390625, %v199_v10 }
 0x160   : > { %v201_v13 = vadd.f32 1e-06, %v200_v11 }
 0x162   : > { %382 = vrsqrt.f32 %v201_v13 }
 0x16c   : > { %v383_v21 = vpop.eup %382 }
 0x16d   : > { %v203_v22 = vmul.f32 %v383_v21, %v193_v5  ;;  %v204_v23 = vmul.f32 %v383_v21, %v194_v6 }
 0x16f   : > { %v217_v26 = vmul.f32 %v210_v19, %v203_v22  ;;  %v218_v27 = vmul.f32 %v214_v20, %v204_v23 }
 0x171   : > { %v231_v28 = vadd.f32 %v224_v24, %v217_v26  ;;  %v232_v29 = vadd.f32 %v228_v25, %v218_v27 }
 0x173   : > { %233 = vst [vmem:[%s186_s10] sm:$0xff] %v231_v28  ;;  %234 = vst [vmem:[%s186_s10 + $0x8] sm:$0xff] %v232_v29 }
 0x174   : > { %427 = shalt.err (!%p424_p4)
}
 0x175   : > { %s428_s29 = scalar_lea.hbm %s631_s20, 256  ;;  %s432_s7 = scalar_lea.hbm %s678_s3, 512 }
 0x176   : > { %p429_p5 = scmp.ne.s32.totalorder %s631_s20, %s428_s29  ;;  %p433_p0 = scmp.lt.u32.totalorder %s631_s20, %s678_s3 }
 0x177   : > { %p434_p1 = scmp.lt.u32.totalorder %s432_s7, %s428_s29  ;;  %p436_p6 = scmp.lt.u32.totalorder %s428_s29, %s631_s20 }
 0x178   : > { %p430_p8 = pnand %p429_p5, %p687_p11 }
 0x179   : > { %p435_p3 = por %p434_p1, %p433_p0 }
 0x17a   : > { %p431_p9 = pneg %p430_p8 }
 0x17b   : > { %p437_p12 = por %p436_p6, %p435_p3 }
 0x17d   : > { %p438_p13 = pnand %p437_p12, %p431_p9 }
 0x17f   : > { %441 = shalt.err (!%p438_p13)
}
 0x180   : > { %338 = dma.vmem_to_hbm [thread:$0]  (%p687_p11), %s633_s11, 256, %s631_s20, %s236_s16  }
 0x181 PF: > { %s262_s6 = sand.u32 1, %s468_s12   ;;  %p688_p7 = scmp.ne.s32.totalorder %s683_s25, 0 }
 0x182   : > { %p689_p10 = scmp.ge.s32.totalorder %s480_s15, 2  ;;  %s263_s8 = scalar_lea.sflag [#allocation4], %s262_s6 }
 0x184   : > { %p345_p2 = pnand %p689_p10, %p688_p7 }
 0x186   : > { %463 = dma.done.wait (!%p345_p2), %s263_s8, 256  }
 0x187   : > { %465 = vsyncadd (!%p345_p2), %s263_s8, 4294967040  ;;  %p16_p4 = scmp.ge.s32.totalorder %s529_s18, 4   ;;  %s690_s12 = smov %s472_s13 }
 0x188   : > { %s691_s13 = smov %s476_s14  ;;  %s692_s14 = smov %s541_s21 }
 0x189   : > { %s693_s15 = smov %s529_s18  ;;  %18 = sbr.rel (!%p16_p4) target bundleno = 5 (0x5), region = 77 }
 0x190   :  { %268 = vsyncpa [#allocation3], 1 }
 0x191   :  { %270 = vsyncpa [#allocation3 + $0x1], 1 }
 0x192   :  { %271 = vsyncpa [#allocation4], 1 }
 0x193   :  { %273 = vsyncpa [#allocation4 + $0x1], 1 }

</bundles_post_ra>
